<compile_context>
chip_gen: v7x
topology: tpu7x:2x2x1
jax: 0.10.0
libtpu: 0.0.40
codegen_flags: <defaults>
</compile_context>

<pallas_src>
import jax
import jax.numpy as jnp
from jax import lax
from jax.experimental import pallas as pl
from jax.experimental.pallas import tpu as pltpu


def _round_up(x, m):
    return (x + m - 1) // m * m


def _qvalue_kernel(obs_ref, act_ref, w1o_ref, w1a_ref, b1_ref,
                   w2_ref, b2_ref, w3t_ref, b3_ref, out_ref):
    # Layer 1: fused concat via split weights: relu(obs@W1o + act@W1a + b1)
    h = jnp.dot(obs_ref[...], w1o_ref[...], preferred_element_type=jnp.float32)
    h = h + jnp.dot(act_ref[...], w1a_ref[...], preferred_element_type=jnp.float32)
    h = jnp.maximum(h + b1_ref[...], 0.0)
    # Layer 2: relu(h@W2 + b2)
    h = jnp.dot(h, w2_ref[...], preferred_element_type=jnp.float32) + b2_ref[...]
    h = jnp.maximum(h, 0.0)
    # Value head, lane-dense: (1, H2) contracted with (TB, H2) -> (1, TB)
    q = lax.dot_general(w3t_ref[...], h, (((1,), (1,)), ((), ())),
                        preferred_element_type=jnp.float32)
    out_ref[...] = (q + b3_ref[0, 0]).astype(out_ref.dtype)


def action_value_forward(obs, actions, params, *, block_b=512):
    """obs: (B, obs_dim), actions: (B, act_dim) -> (B, 1)."""
    w1, b1, w2, b2, w3, b3 = params
    B, obs_dim = obs.shape
    act_dim = actions.shape[-1]
    in_dim = obs_dim + act_dim
    h1 = w1.shape[1]
    h2 = w2.shape[1]

    # Split first-layer weight so we never materialize concat(obs, actions).
    w1o = w1[:obs_dim]          # (obs_dim, H1)
    w1a = w1[obs_dim:]          # (act_dim, H1)
    w3t = w3.T                  # (1, H2)

    # Batch tile: multiple of 128 (lane-dense output), pad B up to it.
    tb = min(block_b, _round_up(B, 128))
    padded_b = _round_up(B, tb)
    pad = padded_b - B
    if pad:
        obs = jnp.pad(obs, ((0, pad), (0, 0)))
        actions = jnp.pad(actions, ((0, pad), (0, 0)))
    grid = (padded_b // tb,)

    def resident(a):  # weights/biases: full block, constant index -> stay in VMEM
        return pl.BlockSpec(a.shape, lambda i: (0,) * a.ndim)

    in_specs = [
        pl.BlockSpec((tb, obs_dim), lambda i: (i, 0)),
        pl.BlockSpec((tb, act_dim), lambda i: (i, 0)),
        resident(w1o), resident(w1a), resident(b1),
        resident(w2), resident(b2), resident(w3t),
        pl.BlockSpec(memory_space=pltpu.MemorySpace.SMEM),   # b3 scalar in SMEM
    ]
    out_specs = pl.BlockSpec((1, tb), lambda i: (0, i))

    # Right-size scoped VMEM: double-buffered io tiles + resident weights
    # + f32 activations, with generous headroom.
    f32 = 4
    io_tile_bytes = tb * (obs_dim + act_dim + 1) * f32
    weight_bytes = (in_dim * h1 + h1 + h1 * h2 + h2 + h2 + 1) * f32
    act_bytes = tb * (h1 + h2) * f32
    vmem_limit = int(max(4 * (2 * io_tile_bytes + weight_bytes + act_bytes),
                         8 * 1024 * 1024))

    cost = pl.CostEstimate(
        flops=2 * padded_b * (in_dim * h1 + h1 * h2 + h2),
        transcendentals=0,
        bytes_accessed=padded_b * (in_dim + 1) * f32 + weight_bytes,
    )

    out_row = pl.pallas_call(
        _qvalue_kernel,
        out_shape=jax.ShapeDtypeStruct((1, padded_b), jnp.float32),
        grid=grid,
        in_specs=in_specs,
        out_specs=out_specs,
        compiler_params=pltpu.CompilerParams(
            dimension_semantics=("parallel",),
            vmem_limit_bytes=vmem_limit,
        ),
        cost_estimate=cost,
    )(obs, actions, w1o, w1a, b1, w2, b2, w3t, b3)

    return out_row[0, :B].reshape(B, 1)


def init_params(key, obs_dim, act_dim, units):
    """Deterministic parameter init (synthetic; shapes match the module)."""
    h1, h2 = units
    in_dim = obs_dim + act_dim
    ks = jax.random.split(key, 6)
    scale = lambda fan_in: 1.0 / jnp.sqrt(jnp.float32(fan_in))
    w1 = jax.random.uniform(ks[0], (in_dim, h1), jnp.float32, -1, 1) * scale(in_dim)
    b1 = jax.random.uniform(ks[1], (1, h1), jnp.float32, -1, 1) * scale(in_dim)
    w2 = jax.random.uniform(ks[2], (h1, h2), jnp.float32, -1, 1) * scale(h1)
    b2 = jax.random.uniform(ks[3], (1, h2), jnp.float32, -1, 1) * scale(h1)
    w3 = jax.random.uniform(ks[4], (h2, 1), jnp.float32, -1, 1) * scale(h2)
    b3 = jax.random.uniform(ks[5], (1, 1), jnp.float32, -1, 1) * scale(h2)
    return (w1, b1, w2, b2, w3, b3)


def _reference(obs, actions, params):
    w1, b1, w2, b2, w3, b3 = params
    x = jnp.concatenate([obs, actions], axis=-1)
    h = jnp.maximum(x @ w1 + b1, 0.0)
    h = jnp.maximum(h @ w2 + b2, 0.0)
    return h @ w3 + b3


if __name__ == "__main__":
    key = jax.random.PRNGKey(0)
    k_obs, k_act, k_par = jax.random.split(key, 3)

    B, OBS, ACT = 4, 16, 8
    UNITS = (32, 32)

    obs = jax.random.normal(k_obs, (B, OBS), jnp.float32)
    actions = jax.random.normal(k_act, (B, ACT), jnp.float32)
    params = init_params(k_par, OBS, ACT, UNITS)

    out = action_value_forward(obs, actions, params)
    out = jax.block_until_ready(out)
    ref = _reference(obs, actions, params)
    assert out.shape == (B, 1)
    assert jnp.allclose(out, ref, atol=1e-4, rtol=1e-4)

    # Also exercise the multi-step batch grid + tail-padding path.
    B2 = 1300
    k1, k2 = jax.random.split(jax.random.PRNGKey(1))
    obs2 = jax.random.normal(k1, (B2, OBS), jnp.float32)
    act2 = jax.random.normal(k2, (B2, ACT), jnp.float32)
    out2 = jax.block_until_ready(action_value_forward(obs2, act2, params))
    ref2 = _reference(obs2, act2, params)
    assert out2.shape == (B2, 1)
    assert jnp.allclose(out2, ref2, atol=1e-4, rtol=1e-4)

    print("KERNEL_OK")
</pallas_src>

<mosaic_0001>
module attributes {stable_mosaic.version = 11 : i64} {
  func.func @_qvalue_kernel(%arg0: i32, %arg1: memref<128x16xf32, #tpu.memory_space<vmem>>, %arg2: memref<128x8xf32, #tpu.memory_space<vmem>>, %arg3: memref<16x32xf32, #tpu.memory_space<vmem>>, %arg4: memref<8x32xf32, #tpu.memory_space<vmem>>, %arg5: memref<1x32xf32, #tpu.memory_space<vmem>>, %arg6: memref<32x32xf32, #tpu.memory_space<vmem>>, %arg7: memref<1x32xf32, #tpu.memory_space<vmem>>, %arg8: memref<1x32xf32, #tpu.memory_space<vmem>>, %arg9: memref<1x1xf32, #tpu.memory_space<smem>>, %arg10: memref<1x128xf32, #tpu.memory_space<vmem>>) attributes {dimension_semantics = [#tpu.dimension_semantics<parallel>], iteration_bounds = array<i64: 1>, scalar_prefetch = 0 : i64, scratch_operands = 0 : i64, tpu.core_type = #tpu.core_type<tc>, window_params = [{transform_indices = @transform_0, window_bounds = array<i64: 128, 16>}, {transform_indices = @transform_1, window_bounds = array<i64: 128, 8>}, {pipeline_mode = #tpu.pipeline_mode<synchronous>, transform_indices = @transform_2, window_bounds = array<i64: 16, 32>}, {pipeline_mode = #tpu.pipeline_mode<synchronous>, transform_indices = @transform_3, window_bounds = array<i64: 8, 32>}, {pipeline_mode = #tpu.pipeline_mode<synchronous>, transform_indices = @transform_4, window_bounds = array<i64: 1, 32>}, {pipeline_mode = #tpu.pipeline_mode<synchronous>, transform_indices = @transform_5, window_bounds = array<i64: 32, 32>}, {pipeline_mode = #tpu.pipeline_mode<synchronous>, transform_indices = @transform_6, window_bounds = array<i64: 1, 32>}, {pipeline_mode = #tpu.pipeline_mode<synchronous>, transform_indices = @transform_7, window_bounds = array<i64: 1, 32>}, {transform_indices = @transform_8, window_bounds = array<i64: 1, 1>}, {transform_indices = @transform_9, window_bounds = array<i64: 1, 128>}]} {
    %c0 = arith.constant 0 : index
    %c0_0 = arith.constant 0 : index
    %0 = vector.load %arg1[%c0, %c0_0] : memref<128x16xf32, #tpu.memory_space<vmem>>, vector<128x16xf32>
    %c0_1 = arith.constant 0 : index
    %c0_2 = arith.constant 0 : index
    %1 = vector.load %arg3[%c0_1, %c0_2] : memref<16x32xf32, #tpu.memory_space<vmem>>, vector<16x32xf32>
    %cst = arith.constant dense<0.000000e+00> : vector<128x32xf32>
    %2 = tpu.matmul %0, %1, %cst {dimension_numbers = #tpu.dot_dimension_numbers<[1], [0], [0], [1], [0, 0, 1, 1], [], []>} : vector<128x16xf32>, vector<16x32xf32>, vector<128x32xf32> -> vector<128x32xf32>
    %c0_3 = arith.constant 0 : index
    %c0_4 = arith.constant 0 : index
    %3 = vector.load %arg2[%c0_3, %c0_4] : memref<128x8xf32, #tpu.memory_space<vmem>>, vector<128x8xf32>
    %c0_5 = arith.constant 0 : index
    %c0_6 = arith.constant 0 : index
    %4 = vector.load %arg4[%c0_5, %c0_6] : memref<8x32xf32, #tpu.memory_space<vmem>>, vector<8x32xf32>
    %cst_7 = arith.constant dense<0.000000e+00> : vector<128x32xf32>
    %5 = tpu.matmul %3, %4, %cst_7 {dimension_numbers = #tpu.dot_dimension_numbers<[1], [0], [0], [1], [0, 0, 1, 1], [], []>} : vector<128x8xf32>, vector<8x32xf32>, vector<128x32xf32> -> vector<128x32xf32>
    %6 = arith.addf %2, %5 : vector<128x32xf32>
    %c0_8 = arith.constant 0 : index
    %c0_9 = arith.constant 0 : index
    %7 = vector.load %arg5[%c0_8, %c0_9] : memref<1x32xf32, #tpu.memory_space<vmem>>, vector<1x32xf32>
    %8 = vector.broadcast %7 : vector<1x32xf32> to vector<128x32xf32>
    %9 = arith.addf %6, %8 : vector<128x32xf32>
    %cst_10 = arith.constant 0.000000e+00 : f32
    %10 = vector.broadcast %cst_10 : f32 to vector<128x32xf32>
    %11 = arith.maximumf %9, %10 : vector<128x32xf32>
    %c0_11 = arith.constant 0 : index
    %c0_12 = arith.constant 0 : index
    %12 = vector.load %arg6[%c0_11, %c0_12] : memref<32x32xf32, #tpu.memory_space<vmem>>, vector<32x32xf32>
    %cst_13 = arith.constant dense<0.000000e+00> : vector<128x32xf32>
    %13 = tpu.matmul %11, %12, %cst_13 {dimension_numbers = #tpu.dot_dimension_numbers<[1], [0], [0], [1], [0, 0, 1, 1], [], []>} : vector<128x32xf32>, vector<32x32xf32>, vector<128x32xf32> -> vector<128x32xf32>
    %c0_14 = arith.constant 0 : index
    %c0_15 = arith.constant 0 : index
    %14 = vector.load %arg7[%c0_14, %c0_15] : memref<1x32xf32, #tpu.memory_space<vmem>>, vector<1x32xf32>
    %15 = vector.broadcast %14 : vector<1x32xf32> to vector<128x32xf32>
    %16 = arith.addf %13, %15 : vector<128x32xf32>
    %cst_16 = arith.constant 0.000000e+00 : f32
    %17 = vector.broadcast %cst_16 : f32 to vector<128x32xf32>
    %18 = arith.maximumf %16, %17 : vector<128x32xf32>
    %c0_17 = arith.constant 0 : index
    %c0_18 = arith.constant 0 : index
    %19 = vector.load %arg8[%c0_17, %c0_18] : memref<1x32xf32, #tpu.memory_space<vmem>>, vector<1x32xf32>
    %cst_19 = arith.constant dense<0.000000e+00> : vector<1x128xf32>
    %20 = tpu.matmul %19, %18, %cst_19 {dimension_numbers = #tpu.dot_dimension_numbers<[1], [1], [0], [0], [0, 0, 1, 0], [], []>} : vector<1x32xf32>, vector<128x32xf32>, vector<1x128xf32> -> vector<1x128xf32>
    %c0_20 = arith.constant 0 : index
    %c0_21 = arith.constant 0 : index
    %21 = memref.load %arg9[%c0_20, %c0_21] : memref<1x1xf32, #tpu.memory_space<smem>>
    %22 = vector.broadcast %21 : f32 to vector<1x128xf32>
    %23 = arith.addf %20, %22 : vector<1x128xf32>
    %c0_22 = arith.constant 0 : index
    %c0_23 = arith.constant 0 : index
    %24 = vector.load %arg10[%c0_22, %c0_23] : memref<1x128xf32, #tpu.memory_space<vmem>>, vector<1x128xf32>
    tpu.vector_store %arg10[%c0_22, %c0_23], %23 {strides = array<i32>} : memref<1x128xf32, #tpu.memory_space<vmem>>, vector<1x128xf32>,
    return
  }
  func.func @transform_0(%arg0: i32) -> (i32, i32) {
    %c0_i32 = arith.constant 0 : i32
    %c0_i32_0 = arith.constant 0 : i32
    return %arg0, %c0_i32 : i32, i32
  }
  func.func @transform_1(%arg0: i32) -> (i32, i32) {
    %c0_i32 = arith.constant 0 : i32
    %c0_i32_0 = arith.constant 0 : i32
    return %arg0, %c0_i32 : i32, i32
  }
  func.func @transform_2(%arg0: i32) -> (i32, i32) {
    %c0_i32 = arith.constant 0 : i32
    %c0_i32_0 = arith.constant 0 : i32
    %c0_i32_1 = arith.constant 0 : i32
    return %c0_i32, %c0_i32_0 : i32, i32
  }
  func.func @transform_3(%arg0: i32) -> (i32, i32) {
    %c0_i32 = arith.constant 0 : i32
    %c0_i32_0 = arith.constant 0 : i32
    %c0_i32_1 = arith.constant 0 : i32
    return %c0_i32, %c0_i32_0 : i32, i32
  }
  func.func @transform_4(%arg0: i32) -> (i32, i32) {
    %c0_i32 = arith.constant 0 : i32
    %c0_i32_0 = arith.constant 0 : i32
    %c0_i32_1 = arith.constant 0 : i32
    return %c0_i32, %c0_i32_0 : i32, i32
  }
  func.func @transform_5(%arg0: i32) -> (i32, i32) {
    %c0_i32 = arith.constant 0 : i32
    %c0_i32_0 = arith.constant 0 : i32
    %c0_i32_1 = arith.constant 0 : i32
    return %c0_i32, %c0_i32_0 : i32, i32
  }
  func.func @transform_6(%arg0: i32) -> (i32, i32) {
    %c0_i32 = arith.constant 0 : i32
    %c0_i32_0 = arith.constant 0 : i32
    %c0_i32_1 = arith.constant 0 : i32
    return %c0_i32, %c0_i32_0 : i32, i32
  }
  func.func @transform_7(%arg0: i32) -> (i32, i32) {
    %c0_i32 = arith.constant 0 : i32
    %c0_i32_0 = arith.constant 0 : i32
    %c0_i32_1 = arith.constant 0 : i32
    return %c0_i32, %c0_i32_0 : i32, i32
  }
  func.func @transform_8(%arg0: i32) -> (i32, i32) {
    %c0_i32 = arith.constant 0 : i32
    %c0_i32_0 = arith.constant 0 : i32
    %c0_i32_1 = arith.constant 0 : i32
    return %c0_i32, %c0_i32_0 : i32, i32
  }
  func.func @transform_9(%arg0: i32) -> (i32, i32) {
    %c0_i32 = arith.constant 0 : i32
    %c0_i32_0 = arith.constant 0 : i32
    return %c0_i32, %arg0 : i32, i32
  }
}

</mosaic_0001>

<bundles_post_ra>
// kernel: tpu_custom_call.1
= control target key start
LH: loop header
LB: loop body
LE: loop exit
PB: predicated region body
PF: predicated region fallthrough
CT: control target
= control target key end

     0   :  { %vm69_vm0 = vcmask 64512   ;;  %s1478_s0 = inlined_call_operand.vmem [shape: f32[128,16], index: 0, kind: input, shape index: {}]   ;;  %s1479_s1 = inlined_call_operand.vmem [shape: f32[128,8], index: 1, kind: input, shape index: {}]   ;;  %s1480_s2 = inlined_call_operand.vmem [shape: f32[16,32], index: 2, kind: input, shape index: {}]   ;;  %s1481_s3 = inlined_call_operand.vmem [shape: f32[8,32], index: 3, kind: input, shape index: {}]   ;;  %s1482_s4 = inlined_call_operand.vmem [shape: f32[1,32], index: 4, kind: input, shape index: {}]   ;;  %s1483_s5 = inlined_call_operand.vmem [shape: f32[32,32], index: 5, kind: input, shape index: {}]   ;;  %s1484_s6 = inlined_call_operand.vmem [shape: f32[1,32], index: 6, kind: input, shape index: {}]   ;;  %s1485_s7 = inlined_call_operand.vmem [shape: f32[1,32], index: 7, kind: input, shape index: {}]   ;;  %s1486_s8 = inlined_call_operand.<no memory space> [shape: f32[1,1], index: 8, kind: input, shape index: {}]   ;;  %s1487_s9 = inlined_call_operand.hbm [shape: f32[1,128], index: 9, kind: output, shape index: {}]  }
   0x1   :  { %v68_v0 = vld [vmem:[%s1481_s3] sm:$0xff]  ;;  %v53_v2 = vld [vmem:[%s1479_s1 + $0x8] sm:$0xff]  ;;  %v54_v5 = vld [vmem:[%s1479_s1 + $0x10] sm:$0xff] }
   0x2   :  { %v52_v1 = vld [vmem:[%s1479_s1] sm:$0xff]  ;;  %995 = vmatprep.subr.mxu0 %v68_v0  ;;  %v51_v4 = vld [vmem:[%s1480_s2 + $0x8] sm:$0xff]  ;;  %v55_v7 = vld [vmem:[%s1479_s1 + $0x18] sm:$0xff] }
   0x3   :  { %997 = vmatprep.mubr.msk.f32.mxu0 %vm69_vm0, %v52_v1  ;;  %v50_v3 = vld [vmem:[%s1480_s2] sm:$0xff]  ;;  %996 = vmatpush3.msra.mxu0 %v68_v0  ;;  %v57_v9 = vld [vmem:[%s1479_s1 + $0x28] sm:$0xff]  ;;  %v58_v10 = vld [vmem:[%s1479_s1 + $0x30] sm:$0xff] }
   0x4   :  { %v1116_v6 = vpack.c.bf16 %v51_v4, %v50_v3  ;;  %998 = vmatmul.mubr.msk.f32.vlgmr.msra.gmra.mrb[0].mxu0 %vm69_vm0, %v53_v2  ;;  %v56_v8 = vld [vmem:[%s1479_s1 + $0x20] sm:$0xff]  ;;  %v59_v12 = vld [vmem:[%s1479_s1 + $0x38] sm:$0xff]  ;;  %v497_v13 = vld [vmem:[%s1483_s5 + $0x8] sm:$0xff] }
   0x5   :  { %1000 = vmatprep.mubr.msk.f32.mxu0 %vm69_vm0, %v54_v5  ;;  %v496_v11 = vld [vmem:[%s1483_s5] sm:$0xff] }
   0x6   :  { %1117 = vmatprep.subr.bf16.mxu0 %v1116_v6 }
   0x7   :  { %1119 = vmatpush3.bf16.msra.mxu0 %v1116_v6 }
   0x8   :  { %1001 = vmatmul.mubr.msk.f32.gmra.mrb[2].mxu0 %vm69_vm0, %v55_v7 }
   0x9   :  { %1003 = vmatprep.mubr.msk.f32.mxu0 %vm69_vm0, %v56_v8 }
   0xc   :  { %1004 = vmatmul.mubr.msk.f32.gmra.mrb[4].mxu0 %vm69_vm0, %v57_v9 }
   0xd   :  { %1006 = vmatprep.mubr.msk.f32.mxu0 %vm69_vm0, %v58_v10 }
   0xe   :  { %15 = vsyncpa [#allocation4], 0  ;;  %v60_v14 = vld [vmem:[%s1479_s1 + $0x40] sm:$0xff]  ;;  %v1120_v15 = vpack.c.bf16 %v497_v13, %v496_v11  ;;  %v61_v16 = vld [vmem:[%s1479_s1 + $0x48] sm:$0xff]  ;;  %vm263_vm1 = vcmask 130048   ;;  %vm507_vm2 = vcmask 261120  }
   0xf   :  { %v62_v17 = vld [vmem:[%s1479_s1 + $0x50] sm:$0xff]  ;;  %v63_v18 = vld [vmem:[%s1479_s1 + $0x58] sm:$0xff]  ;;  %v64_v19 = vld [vmem:[%s1479_s1 + $0x60] sm:$0xff]  ;;  %vm1205_vm3 = vmmov 0   ;;  %s1207_s19 = smov [#allocation3]  }
  0x10   :  { %1007 = vmatmul.mubr.msk.f32.gmra.mrb[6].mxu0 %vm69_vm0, %v59_v12  ;;  %1121 = vmatprep.subr.bf16.mxu1 %v1120_v15  ;;  %v65_v20 = vld [vmem:[%s1479_s1 + $0x68] sm:$0xff]  ;;  %v66_v21 = vld [vmem:[%s1479_s1 + $0x70] sm:$0xff]  ;;  %v67_v22 = vld [vmem:[%s1479_s1 + $0x78] sm:$0xff]  ;;  %s848_s20 = sshll.u32 %s1207_s19, 4  ;;  %s849_s20 = int_to_ptr.vmem [resolvable:$true] %s848_s20 }
  0x11   :  { %1009 = vmatprep.mubr.msk.f32.mxu0 %vm69_vm0, %v60_v14  ;;  %1123 = vmatpush3.bf16.msra.mxu1 %v1120_v15  ;;  %v34_v23 = vld [vmem:[%s1478_s0] sm:$0xff]  ;;  %v35_v24 = vld [vmem:[%s1478_s0 + $0x8] sm:$0xff]  ;;  %v36_v25 = vld [vmem:[%s1478_s0 + $0x10] sm:$0xff]  ;;  %s1180_s21 = scalar_lea.vmem %s849_s20, 16  ;;  %s1184_s22 = scalar_lea.vmem %s849_s20, 32 }
  0x12   :  { %v37_v26 = vld [vmem:[%s1478_s0 + $0x18] sm:$0xff]  ;;  %v38_v27 = vld [vmem:[%s1478_s0 + $0x20] sm:$0xff]  ;;  %v39_v28 = vld [vmem:[%s1478_s0 + $0x28] sm:$0xff]  ;;  %p1181_p0 = scmp.ne.s32.totalorder %s849_s20, %s1180_s21  ;;  %p1185_p1 = scmp.lt.s32.totalorder %s849_s20, %s849_s20 }
  0x13   :  { %v40_v29 = vld [vmem:[%s1478_s0 + $0x30] sm:$0xff]  ;;  %v41_v30 = vld [vmem:[%s1478_s0 + $0x38] sm:$0xff]  ;;  %v42_v31 = vld [vmem:[%s1478_s0 + $0x40] sm:$0xff]  ;;  %p1186_p2 = scmp.lt.s32.totalorder %s1184_s22, %s1180_s21 }
  0x14   :  { %1010 = vmatmul.mubr.msk.f32.gmra.mrb[8].mxu0 %vm69_vm0, %v61_v16  ;;  %v43_v32 = vld [vmem:[%s1478_s0 + $0x48] sm:$0xff]  ;;  %v44_v33 = vld [vmem:[%s1478_s0 + $0x50] sm:$0xff]  ;;  %v45_v34 = vld [vmem:[%s1478_s0 + $0x58] sm:$0xff] }
  0x15   :  { %1012 = vmatprep.mubr.msk.f32.mxu0 %vm69_vm0, %v62_v17  ;;  %v46_v35 = vld [vmem:[%s1478_s0 + $0x60] sm:$0xff]  ;;  %v47_v36 = vld [vmem:[%s1478_s0 + $0x68] sm:$0xff]  ;;  %v48_v37 = vld [vmem:[%s1478_s0 + $0x70] sm:$0xff]  ;;  %p1187_p3 = por %p1186_p2, %p1185_p1 }
  0x16   :  { %v49_v38 = vld [vmem:[%s1478_s0 + $0x78] sm:$0xff]  ;;  %v498_v39 = vld [vmem:[%s1483_s5 + $0x10] sm:$0xff]  ;;  %v888_v42 = vld [vmem:[%s1482_s4] ss:$0 sm:$0xff] }
  0x17   :  { %v499_v40 = vld [vmem:[%s1483_s5 + $0x18] sm:$0xff]  ;;  %vm1432_vm4 = vmpackc.low %vm507_vm2, %vm507_vm2  ;;  %p1188_p4 = pnand %p1187_p3, %p1181_p0 }
  0x18   :  { %1013 = vmatmul.mubr.msk.f32.gmra.mrb[10].mxu0 %vm69_vm0, %v63_v18  ;;  %v1124_v41 = vpack.c.bf16 %v499_v40, %v498_v39 }
  0x19   :  { %1015 = vmatprep.mubr.msk.f32.mxu0 %vm69_vm0, %v64_v19 }
  0x1a   :  { %1125 = vmatprep.subr.bf16.mxu1 %v1124_v41 }
  0x1b   :  { %1127 = vmatpush3.bf16.msra.mxu1 %v1124_v41 }
  0x1c   :  { %1016 = vmatmul.mubr.msk.f32.gmra.mrb[12].mxu0 %vm69_vm0, %v65_v20 }
  0x1d   :  { %1018 = vmatprep.mubr.msk.f32.mxu0 %vm69_vm0, %v66_v21 }
  0x20   :  { %1019 = vmatmul.mubr.msk.f32.gmra.mrb[14].mxu0 %vm69_vm0, %v67_v22 }
  0x21   :  { %1025 = vmatprep.mubr.msk.f32.mxu0 %vm263_vm1, %v34_v23 }
  0x24   :  { %1026 = vmatmul.mubr.msk.f32.vlgmr.msra.gmra.mrb[0].mxu0 %vm263_vm1, %v35_v24 }
  0x25   :  { %1028 = vmatprep.mubr.msk.f32.mxu0 %vm263_vm1, %v36_v25 }
  0x28   :  { %1029 = vmatmul.mubr.msk.f32.gmra.mrb[2].mxu0 %vm263_vm1, %v37_v26 }
  0x29   :  { %1031 = vmatprep.mubr.msk.f32.mxu0 %vm263_vm1, %v38_v27  ;;  %v1204_v27 = vmov 0.0|0.0  }
  0x2a   :  { %1128 = vmatprep.subr.bf16.mxu1 %v1204_v27 }
  0x2c   :  { %1032 = vmatmul.mubr.msk.f32.gmra.mrb[4].mxu0 %vm263_vm1, %v39_v28  ;;  %v1206_v28 = vmov 0.0  }
  0x2d   :  { %1034 = vmatprep.mubr.msk.f32.mxu0 %vm263_vm1, %v40_v29  ;;  %v889_v29 = vld [vmem:[%s1484_s6] ss:$0 sm:$0xff] }
  0x30   :  { %1035 = vmatmul.mubr.msk.f32.gmra.mrb[6].mxu0 %vm263_vm1, %v41_v30 }
  0x31   :  { %1037 = vmatprep.mubr.msk.f32.mxu0 %vm263_vm1, %v42_v31 }
  0x34   :  { %1038 = vmatmul.mubr.msk.f32.gmra.mrb[8].mxu0 %vm263_vm1, %v43_v32 }
  0x35   :  { %1040 = vmatprep.mubr.msk.f32.mxu0 %vm263_vm1, %v44_v33 }
  0x38   :  { %1041 = vmatmul.mubr.msk.f32.gmra.mrb[10].mxu0 %vm263_vm1, %v45_v34 }
  0x39   :  { %1043 = vmatprep.mubr.msk.f32.mxu0 %vm263_vm1, %v46_v35 }
  0x3c   :  { %1044 = vmatmul.mubr.msk.f32.gmra.mrb[12].mxu0 %vm263_vm1, %v47_v36 }
  0x3d   :  { %1046 = vmatprep.mubr.msk.f32.mxu0 %vm263_vm1, %v48_v37 }
  0x40   :  { %1047 = vmatmul.mubr.msk.f32.gmra.mrb[14].mxu0 %vm263_vm1, %v49_v38 }
  0xf7   :  { %v1027_v43 = vpop.f32.mrb[0].mxu0 }
  0xf8   :  { %v465_v44 = vadd.f32 %v1027_v43, %v888_v42  ;;  %v378_v45 = vpop.f32.mrb[1].mxu0 }
  0xf9   :  { %v464_v46 = vadd.f32 %v888_v42, %v378_v45 }
  0xfa   :  { %v481_v49 = vmax.f32 %v465_v44, 0.0 }
  0xfb   :  { %v480_v47 = vmax.f32 %v464_v46, 0.0  ;;  %v1030_v48 = vpop.f32.mrb[2].mxu0 }
  0xfc   :  { %v467_v50 = vadd.f32 %v1030_v48, %v888_v42  ;;  %v388_v51 = vpop.f32.mrb[3].mxu0 }
  0xfd   :  { %v466_v52 = vadd.f32 %v888_v42, %v388_v51  ;;  %1057 = vmatprep.mubr.msk.f32.mxu1 %vm507_vm2, %v480_v47 }
  0xfe   :  { %1058 = vmatmul.mubr.msk.f32.vlgmr.msra.gmra.mrb[0].mxu1 %vm507_vm2, %v481_v49  ;;  %v483_v55 = vmax.f32 %v467_v50, 0.0 }
  0xff   :  { %v482_v53 = vmax.f32 %v466_v52, 0.0  ;;  %v1033_v54 = vpop.f32.mrb[4].mxu0 }
 0x100   :  { %v469_v56 = vadd.f32 %v1033_v54, %v888_v42  ;;  %v398_v57 = vpop.f32.mrb[5].mxu0 }
 0x101   :  { %v468_v58 = vadd.f32 %v888_v42, %v398_v57  ;;  %1060 = vmatprep.mubr.msk.f32.mxu1 %vm507_vm2, %v482_v53 }
 0x102   :  { %1061 = vmatmul.mubr.msk.f32.gmra.mrb[2].mxu1 %vm507_vm2, %v483_v55  ;;  %v485_v61 = vmax.f32 %v469_v56, 0.0 }
 0x103   :  { %v484_v59 = vmax.f32 %v468_v58, 0.0  ;;  %v1036_v60 = vpop.f32.mrb[6].mxu0 }
 0x104   :  { %v471_v62 = vadd.f32 %v1036_v60, %v888_v42  ;;  %v408_v63 = vpop.f32.mrb[7].mxu0 }
 0x105   :  { %v470_v0 = vadd.f32 %v888_v42, %v408_v63  ;;  %1063 = vmatprep.mubr.msk.f32.mxu1 %vm507_vm2, %v484_v59 }
 0x106   :  { %1064 = vmatmul.mubr.msk.f32.gmra.mrb[4].mxu1 %vm507_vm2, %v485_v61  ;;  %v487_v3 = vmax.f32 %v471_v62, 0.0 }
 0x107   :  { %v486_v1 = vmax.f32 %v470_v0, 0.0  ;;  %v1039_v2 = vpop.f32.mrb[8].mxu0 }
 0x108   :  { %v473_v4 = vadd.f32 %v1039_v2, %v888_v42  ;;  %v418_v5 = vpop.f32.mrb[9].mxu0 }
 0x109   :  { %v472_v6 = vadd.f32 %v888_v42, %v418_v5  ;;  %1066 = vmatprep.mubr.msk.f32.mxu1 %vm507_vm2, %v486_v1 }
 0x10a   :  { %1067 = vmatmul.mubr.msk.f32.gmra.mrb[6].mxu1 %vm507_vm2, %v487_v3  ;;  %v489_v9 = vmax.f32 %v473_v4, 0.0 }
 0x10b   :  { %v488_v7 = vmax.f32 %v472_v6, 0.0  ;;  %v1042_v8 = vpop.f32.mrb[10].mxu0 }
 0x10c   :  { %v475_v10 = vadd.f32 %v1042_v8, %v888_v42  ;;  %v428_v11 = vpop.f32.mrb[11].mxu0 }
 0x10d   :  { %v474_v12 = vadd.f32 %v888_v42, %v428_v11  ;;  %1069 = vmatprep.mubr.msk.f32.mxu1 %vm507_vm2, %v488_v7 }
 0x10e   :  { %1070 = vmatmul.mubr.msk.f32.gmra.mrb[8].mxu1 %vm507_vm2, %v489_v9  ;;  %v491_v15 = vmax.f32 %v475_v10, 0.0 }
 0x10f   :  { %v490_v13 = vmax.f32 %v474_v12, 0.0  ;;  %v1045_v14 = vpop.f32.mrb[12].mxu0 }
 0x110   :  { %v477_v16 = vadd.f32 %v1045_v14, %v888_v42  ;;  %v438_v17 = vpop.f32.mrb[13].mxu0 }
 0x111   :  { %v476_v18 = vadd.f32 %v888_v42, %v438_v17  ;;  %1072 = vmatprep.mubr.msk.f32.mxu1 %vm507_vm2, %v490_v13 }
 0x112   :  { %1073 = vmatmul.mubr.msk.f32.gmra.mrb[10].mxu1 %vm507_vm2, %v491_v15  ;;  %v493_v21 = vmax.f32 %v477_v16, 0.0 }
 0x113   :  { %v492_v19 = vmax.f32 %v476_v18, 0.0  ;;  %v1048_v20 = vpop.f32.mrb[14].mxu0 }
 0x114   :  { %v479_v22 = vadd.f32 %v1048_v20, %v888_v42  ;;  %v448_v23 = vpop.f32.mrb[15].mxu0 }
 0x115   :  { %v478_v24 = vadd.f32 %v888_v42, %v448_v23  ;;  %1075 = vmatprep.mubr.msk.f32.mxu1 %vm507_vm2, %v492_v19  ;;  %v717_v23 = vld [vmem:[%s1485_s7] sm:$0x1] }
 0x116   :  { %1076 = vmatmul.mubr.msk.f32.gmra.mrb[12].mxu1 %vm507_vm2, %v493_v21  ;;  %v495_v26 = vmax.f32 %v479_v22, 0.0 }
 0x117   :  { %v494_v25 = vmax.f32 %v478_v24, 0.0  ;;  %v719_v24 = vstv %s1486_s8 }
 0x119   :  { %1078 = vmatprep.mubr.msk.f32.mxu1 %vm507_vm2, %v494_v25 }
 0x11a   :  { %1079 = vmatmul.mubr.msk.f32.gmra.mrb[14].mxu1 %vm507_vm2, %v495_v26 }
 0x11b   :  { %1113 = vmatprep.mubr.msk.f32.mxu1 %vm1205_vm3, %v1206_v28 }
 0x1d1   :  { %v1059_v30 = vpop.f32.mrb[0].mxu1 }
 0x1d2   :  { %v628_v31 = vadd.f32 %v1059_v30, %v889_v29  ;;  %v622_v32 = vpop.f32.mrb[1].mxu1 }
 0x1d3   :  { %v623_v33 = vadd.f32 %v889_v29, %v622_v32 }
 0x1d4   :  { %v702_v34 = vmax.f32 %v628_v31, 0.0 }
 0x1d5   :  { %v701_v35 = vmax.f32 %v623_v33, 0.0  ;;  %v1062_v36 = vpop.f32.mrb[2].mxu1 }
 0x1d6   :  { %v638_v37 = vadd.f32 %v1062_v36, %v889_v29  ;;  %v632_v38 = vpop.f32.mrb[3].mxu1 }
 0x1d7   :  { %v1129_v40 = vpack.c.bf16 %v702_v34, %v701_v35  ;;  %v633_v41 = vadd.f32 %v889_v29, %v632_v38 }
 0x1d8   :  { %v704_v42 = vmax.f32 %v638_v37, 0.0 }
 0x1d9   :  { %v703_v43 = vmax.f32 %v633_v41, 0.0  ;;  %v1065_v44 = vpop.f32.mrb[4].mxu1  ;;  %1131 = vmatpush3.bf16.xpose.msk.msra.mxu1 %vm1432_vm4, %v1129_v40 }
 0x1da   :  { %v648_v45 = vadd.f32 %v1065_v44, %v889_v29  ;;  %v642_v46 = vpop.f32.mrb[5].mxu1  ;;  %1132 = vmatprep.subr.bf16.mxu1 %v1204_v27 }
 0x1db   :  { %v1133_v47 = vpack.c.bf16 %v704_v42, %v703_v43  ;;  %v643_v48 = vadd.f32 %v889_v29, %v642_v46 }
 0x1dc   :  { %v706_v49 = vmax.f32 %v648_v45, 0.0 }
 0x1dd   :  { %v705_v50 = vmax.f32 %v643_v48, 0.0  ;;  %v1068_v51 = vpop.f32.mrb[6].mxu1 }
 0x1de   :  { %v658_v52 = vadd.f32 %v1068_v51, %v889_v29  ;;  %v652_v53 = vpop.f32.mrb[7].mxu1 }
 0x1df   :  { %v1137_v54 = vpack.c.bf16 %v706_v49, %v705_v50  ;;  %v653_v55 = vadd.f32 %v889_v29, %v652_v53 }
 0x1e0   :  { %v708_v56 = vmax.f32 %v658_v52, 0.0 }
 0x1e1   :  { %v707_v57 = vmax.f32 %v653_v55, 0.0  ;;  %v1071_v58 = vpop.f32.mrb[8].mxu1  ;;  %1135 = vmatpush3.bf16.xpose.msk.msra.mxu1 %vm1432_vm4, %v1133_v47 }
 0x1e2   :  { %v668_v59 = vadd.f32 %v1071_v58, %v889_v29  ;;  %v662_v60 = vpop.f32.mrb[9].mxu1  ;;  %1136 = vmatprep.subr.bf16.mxu1 %v1204_v27 }
 0x1e3   :  { %v1141_v61 = vpack.c.bf16 %v708_v56, %v707_v57  ;;  %v663_v62 = vadd.f32 %v889_v29, %v662_v60 }
 0x1e4   :  { %v710_v63 = vmax.f32 %v668_v59, 0.0 }
 0x1e5   :  { %v709_v0 = vmax.f32 %v663_v62, 0.0  ;;  %v1074_v1 = vpop.f32.mrb[10].mxu1 }
 0x1e6   :  { %v678_v2 = vadd.f32 %v1074_v1, %v889_v29  ;;  %v672_v3 = vpop.f32.mrb[11].mxu1 }
 0x1e7   :  { %v1145_v4 = vpack.c.bf16 %v710_v63, %v709_v0  ;;  %v673_v5 = vadd.f32 %v889_v29, %v672_v3 }
 0x1e8   :  { %v712_v6 = vmax.f32 %v678_v2, 0.0 }
 0x1e9   :  { %v711_v7 = vmax.f32 %v673_v5, 0.0  ;;  %v1077_v8 = vpop.f32.mrb[12].mxu1  ;;  %1139 = vmatpush3.bf16.xpose.msk.msra.mxu1 %vm1432_vm4, %v1137_v54 }
 0x1ea   :  { %v688_v9 = vadd.f32 %v1077_v8, %v889_v29  ;;  %v682_v10 = vpop.f32.mrb[13].mxu1  ;;  %1140 = vmatprep.subr.bf16.mxu1 %v1204_v27 }
 0x1eb   :  { %v1149_v11 = vpack.c.bf16 %v712_v6, %v711_v7  ;;  %v683_v12 = vadd.f32 %v889_v29, %v682_v10 }
 0x1ec   :  { %v714_v13 = vmax.f32 %v688_v9, 0.0 }
 0x1ed   :  { %v713_v14 = vmax.f32 %v683_v12, 0.0  ;;  %v1080_v15 = vpop.f32.mrb[14].mxu1 }
 0x1ee   :  { %v698_v16 = vadd.f32 %v1080_v15, %v889_v29  ;;  %v692_v17 = vpop.f32.mrb[15].mxu1 }
 0x1ef   :  { %v1153_v18 = vpack.c.bf16 %v714_v13, %v713_v14  ;;  %v693_v19 = vadd.f32 %v889_v29, %v692_v17 }
 0x1f0   :  { %v716_v20 = vmax.f32 %v698_v16, 0.0 }
 0x1f1   :  { %v715_v21 = vmax.f32 %v693_v19, 0.0  ;;  %1143 = vmatpush3.bf16.xpose.msk.msra.mxu1 %vm1432_vm4, %v1141_v61 }
 0x1f2   :  { %1144 = vmatprep.subr.bf16.mxu1 %v1204_v27 }
 0x1f3   :  { %v1157_v22 = vpack.c.bf16 %v716_v20, %v715_v21 }
 0x1f9   :  { %1147 = vmatpush3.bf16.xpose.msk.msra.mxu1 %vm1432_vm4, %v1145_v4 }
 0x1fa   :  { %1148 = vmatprep.subr.bf16.mxu1 %v1204_v27 }
 0x201   :  { %1151 = vmatpush3.bf16.xpose.msk.msra.mxu1 %vm1432_vm4, %v1149_v11 }
 0x202   :  { %1152 = vmatprep.subr.bf16.mxu1 %v1204_v27 }
 0x209   :  { %1155 = vmatpush3.bf16.xpose.msk.msra.mxu1 %vm1432_vm4, %v1153_v18 }
 0x20a   :  { %1156 = vmatprep.subr.bf16.mxu1 %v1204_v27 }
 0x211   :  { %1159 = vmatpush3.bf16.xpose.msk.msra.mxu1 %vm1432_vm4, %v1157_v22 }
 0x218   :  { %1114 = vmatmul.mubr.msk.f32.vlgmr.msra.gmra.mrb[16].mxu1 %vm507_vm2, %v717_v23 }
 0x2eb   :  { %v837_v25 = vpop.f32.mrb[16].mxu1 }
 0x2ec   :  { %v838_v26 = vadd.f32 %v837_v25, %v719_v24  ;;  %v1115_v28 = vpop.f32.mrb[17].mxu1 }
 0x2ee   :  { %841 = vst [vmem:[#allocation3] sm:$0x1] %v838_v26 }
 0x2ef   :  { %1191 = shalt.err (!%p1188_p4)
}
 0x2f0   :  { %s1192_s2 = scalar_lea.hbm %s1487_s9, 16 }
 0x2f1   :  { %p1193_p5 = scmp.ne.s32.totalorder %s1487_s9, %s1192_s2  ;;  %p1196_p6 = scmp.lt.u32.totalorder %s1192_s2, %s1487_s9 }
 0x2f3   :  { %p1198_p7 = pnand %p1196_p6, %p1193_p5 }
 0x2f5   :  { %1201 = shalt.err (!%p1198_p7)
}
 0x2f6   :  { %851 = dma.vmem_to_hbm [thread:$0]  %s849_s20, 16, %s1487_s9, [#allocation4]  }
 0x2f7   :  { %1202 = dma.done.wait [#allocation4], 16  }
 0x2f8   :  { %1203 = vsyncadd [#allocation4], 4294967280 }
 0x2f9   :  { %855 = vsyncpa [#allocation4], 1 }

</bundles_post_ra>
